<compile_context>
chip_gen: v7x
topology: tpu7x:2x2x1
jax: 0.10.0
libtpu: 0.0.40
codegen_flags: <defaults>
</compile_context>

<pallas_src>
import jax
import jax.numpy as jnp
from jax.experimental import pallas as pl
from jax.experimental.pallas import tpu as pltpu


def _round_up(x, m):
    return ((x + m - 1) // m) * m


def fusion_kernel(a_hs_ref, a_mask_ref, t_hs_ref, t_mask_ref,
                  vid_ref, a_cnt_ref, t_cnt_ref,
                  w1a_ref, w1v_ref, w1t_ref, b1_ref, w2_ref, b2_ref,
                  out_ref, a_sum_ref, t_sum_ref):
    t = pl.program_id(1)

    # ---- init accumulators at the first time tile of this batch tile ----
    @pl.when(t == 0)
    def _init():
        a_sum_ref[...] = jnp.zeros_like(a_sum_ref)
        t_sum_ref[...] = jnp.zeros_like(t_sum_ref)

    # ---- masked partial sums over this time tile (f32 accumulation) ----
    a_hs = a_hs_ref[...].astype(jnp.float32)                     # [Bt, Tt, Dh]
    a_mask = a_mask_ref[...][:, :, None]                         # [Bt, Tt, 1]
    a_sum_ref[...] += jnp.sum(a_hs * a_mask, axis=1)             # [Bt, Dh]

    t_hs = t_hs_ref[...].astype(jnp.float32)                     # [Bt, Tt, Dt]
    t_mask = t_mask_ref[...][:, :, None]
    t_sum_ref[...] += jnp.sum(t_hs * t_mask, axis=1)             # [Bt, Dt]

    # ---- finalize: pooling + fusion Linear + ReLU + classifier, once per batch tile ----
    @pl.when(t == pl.num_programs(1) - 1)
    def _finalize():
        a_pool = a_sum_ref[...] / a_cnt_ref[...]                 # counts pre-clamped (1e-9)
        t_pool = t_sum_ref[...] / t_cnt_ref[...]
        # cat([a_pool, vid, t_pool]) @ W1 + b1, done as split matmuls (identical math)
        h = (jnp.dot(a_pool, w1a_ref[...], preferred_element_type=jnp.float32)
             + jnp.dot(vid_ref[...], w1v_ref[...], preferred_element_type=jnp.float32)
             + jnp.dot(t_pool, w1t_ref[...], preferred_element_type=jnp.float32)
             + b1_ref[...])
        h = jnp.maximum(h, 0.0)                                  # ReLU; Dropout = identity (eval)
        out_ref[...] = (jnp.dot(h, w2_ref[...], preferred_element_type=jnp.float32)
                        + b2_ref[...])


def fusion_forward(audio_hidden, audio_mask, video_feat, text_hidden, text_mask,
                   w1, b1, w2, b2, *, b_tile=None, t_tile=None):
    """w1: (Dh+Dv+Dt, fusion_dim); b1: (fusion_dim,); w2: (fusion_dim, C); b2: (C,)."""
    B, Ta, Dh = audio_hidden.shape
    _, Tt, Dt = text_hidden.shape
    Dv = video_feat.shape[1]
    F = w1.shape[1]
    C = w2.shape[1]

    # ---- tile sizes: conservative so (2 streams x 2 buffers + weights) fits v7x's 64 MiB ----
    max_t = max(Ta, Tt)
    if t_tile is None:
        t_tile = min(128, _round_up(max_t, 16))      # multiple of 16 for bf16 sublane packing
    T_pad = _round_up(max_t, t_tile)

    if b_tile is None:
        b_tile = B if B <= 8 else 8                  # 8-sublane friendly batch tiling
    B_pad = _round_up(B, b_tile)

    Cp = _round_up(C, 128)                           # lane-dense output (no masked stores)

    # ---- pad + cast in the wrapper; bf16 hidden states halve HBM traffic ----
    def pad3(x, T):
        return jnp.pad(x, ((0, B_pad - x.shape[0]), (0, T - x.shape[1]), (0, 0)))

    def pad2(x, T):
        return jnp.pad(x, ((0, B_pad - x.shape[0]), (0, T - x.shape[1])))

    a_hs = pad3(audio_hidden.astype(jnp.float32), T_pad).astype(jnp.bfloat16)
    t_hs = pad3(text_hidden.astype(jnp.float32), T_pad).astype(jnp.bfloat16)
    a_mk = pad2(audio_mask.astype(jnp.float32), T_pad)   # zero-padded -> padded tiles add 0
    t_mk = pad2(text_mask.astype(jnp.float32), T_pad)
    vid = jnp.pad(video_feat.astype(jnp.float32), ((0, B_pad - B), (0, 0)))

    # clamped denominators precomputed (tiny [B,1] inputs; no in-kernel mask reduction)
    a_cnt = jnp.maximum(jnp.sum(a_mk, axis=1, keepdims=True), 1e-9)
    t_cnt = jnp.maximum(jnp.sum(t_mk, axis=1, keepdims=True), 1e-9)

    # split the fusion weight along its input dim (concat order: audio, video, text)
    w1a = w1[:Dh].astype(jnp.float32)
    w1v = w1[Dh:Dh + Dv].astype(jnp.float32)
    w1t = w1[Dh + Dv:].astype(jnp.float32)
    b1_2d = b1.reshape(1, F).astype(jnp.float32)
    w2_p = jnp.pad(w2.astype(jnp.float32), ((0, 0), (0, Cp - C)))
    b2_p = jnp.pad(b2.reshape(1, C).astype(jnp.float32), ((0, 0), (0, Cp - C)))

    nb = B_pad // b_tile
    nt = T_pad // t_tile

    grid_spec = pltpu.PrefetchScalarGridSpec(
        num_scalar_prefetch=0,
        grid=(nb, nt),
        in_specs=[
            pl.BlockSpec((b_tile, t_tile, Dh), lambda b, t: (b, t, 0)),   # audio hidden (bf16)
            pl.BlockSpec((b_tile, t_tile), lambda b, t: (b, t)),          # audio mask
            pl.BlockSpec((b_tile, t_tile, Dt), lambda b, t: (b, t, 0)),   # text hidden (bf16)
            pl.BlockSpec((b_tile, t_tile), lambda b, t: (b, t)),          # text mask
            pl.BlockSpec((b_tile, Dv), lambda b, t: (b, 0)),              # video features
            pl.BlockSpec((b_tile, 1), lambda b, t: (b, 0)),               # audio count
            pl.BlockSpec((b_tile, 1), lambda b, t: (b, 0)),               # text count
            pl.BlockSpec((Dh, F), lambda b, t: (0, 0)),                   # weights: resident
            pl.BlockSpec((Dv, F), lambda b, t: (0, 0)),
            pl.BlockSpec((Dt, F), lambda b, t: (0, 0)),
            pl.BlockSpec((1, F), lambda b, t: (0, 0)),
            pl.BlockSpec((F, Cp), lambda b, t: (0, 0)),
            pl.BlockSpec((1, Cp), lambda b, t: (0, 0)),
        ],
        out_specs=pl.BlockSpec((b_tile, Cp), lambda b, t: (b, 0)),
        scratch_shapes=[pltpu.VMEM((b_tile, Dh), jnp.float32),
                        pltpu.VMEM((b_tile, Dt), jnp.float32)],
    )

    flops = int(4 * B_pad * T_pad * (Dh + Dt)
                + 2 * B_pad * ((Dh + Dv + Dt) * F + F * Cp))
    bytes_accessed = int(a_hs.size * 2 + t_hs.size * 2
                         + (a_mk.size + t_mk.size + vid.size
                            + a_cnt.size + t_cnt.size) * 4
                         + (w1a.size + w1v.size + w1t.size + b1_2d.size
                            + w2_p.size + b2_p.size) * 4
                         + B_pad * Cp * 4)

    out = pl.pallas_call(
        fusion_kernel,
        out_shape=jax.ShapeDtypeStruct((B_pad, Cp), jnp.float32),
        grid_spec=grid_spec,
        compiler_params=pltpu.CompilerParams(
            dimension_semantics=("parallel", "arbitrary"),
            vmem_limit_bytes=48 * 1024 * 1024,
        ),
        cost_estimate=pl.CostEstimate(flops=flops, transcendentals=0,
                                      bytes_accessed=bytes_accessed),
    )(a_hs, a_mk, t_hs, t_mk, vid, a_cnt, t_cnt,
      w1a, w1v, w1t, b1_2d, w2_p, b2_p)

    return out[:B, :C]


def reference_forward(audio_hidden, audio_mask, video_feat, text_hidden, text_mask,
                      w1, b1, w2, b2):
    am = audio_mask[..., None]
    a_pool = (audio_hidden * am).sum(1) / jnp.maximum(am.sum(1), 1e-9)
    tm = text_mask[..., None]
    t_pool = (text_hidden * tm).sum(1) / jnp.maximum(tm.sum(1), 1e-9)
    fused = jnp.concatenate([a_pool, video_feat, t_pool], axis=1)
    h = jnp.maximum(fused @ w1 + b1, 0.0)
    return h @ w2 + b2


if __name__ == "__main__":
    # Small shapes consistent with the module's forward (true dims: Dh=768, Dv=512, Dt=768,
    # fusion_dim=512).  Scaled down for the synthetic test.
    B, Ta, Dh = 2, 8, 32      # audio: [B, Ta, Dh] hubert last_hidden_state
    Dv = 16                   # video embedding
    Tt, Dt = 8, 32            # text: [B, Tt, Dt] last_hidden_state
    fusion_dim = 32
    num_classes_humor = 2

    key = jax.random.PRNGKey(0)
    k = jax.random.split(key, 9)

    audio_hidden = jax.random.normal(k[0], (B, Ta, Dh), dtype=jnp.float32)
    text_hidden = jax.random.normal(k[1], (B, Tt, Dt), dtype=jnp.float32)
    video_feat = jax.random.normal(k[2], (B, Dv), dtype=jnp.float32)

    # Attention masks with some padding (frame-level for audio, token-level for text).
    audio_mask = (jnp.arange(Ta)[None, :] < jnp.array([[6], [8]])).astype(jnp.float32)
    text_mask = (jnp.arange(Tt)[None, :] < jnp.array([[5], [7]])).astype(jnp.float32)

    # Deterministic parameter init (fusion Linear + classifier Linear).
    fusion_in = Dh + Dv + Dt
    w1 = 0.02 * jax.random.normal(k[3], (fusion_in, fusion_dim), dtype=jnp.float32)
    b1 = 0.01 * jax.random.normal(k[4], (fusion_dim,), dtype=jnp.float32)
    w2 = 0.02 * jax.random.normal(k[5], (fusion_dim, num_classes_humor), dtype=jnp.float32)
    b2 = 0.01 * jax.random.normal(k[6], (num_classes_humor,), dtype=jnp.float32)

    logits = fusion_forward(audio_hidden, audio_mask, video_feat, text_hidden, text_mask,
                            w1, b1, w2, b2)
    logits = jax.block_until_ready(logits)

    # Reference uses the same intentional bf16 quantization of the streamed hidden states.
    a_hs_r = audio_hidden.astype(jnp.bfloat16).astype(jnp.float32)
    t_hs_r = text_hidden.astype(jnp.bfloat16).astype(jnp.float32)
    ref = reference_forward(a_hs_r, audio_mask, video_feat, t_hs_r, text_mask,
                            w1, b1, w2, b2)

    assert logits.shape == (B, num_classes_humor)
    assert jnp.allclose(logits, ref, atol=1e-2, rtol=1e-2), "mismatch vs. reference"

    print("KERNEL_OK")
</pallas_src>

<mosaic_0001>
module attributes {stable_mosaic.version = 11 : i64} {
  func.func @fusion_kernel(%arg0: i32, %arg1: i32, %arg2: memref<2x16x32xbf16, #tpu.memory_space<vmem>>, %arg3: memref<2x16xf32, #tpu.memory_space<vmem>>, %arg4: memref<2x16x32xbf16, #tpu.memory_space<vmem>>, %arg5: memref<2x16xf32, #tpu.memory_space<vmem>>, %arg6: memref<2x16xf32, #tpu.memory_space<vmem>>, %arg7: memref<2x1xf32, #tpu.memory_space<vmem>>, %arg8: memref<2x1xf32, #tpu.memory_space<vmem>>, %arg9: memref<32x32xf32, #tpu.memory_space<vmem>>, %arg10: memref<16x32xf32, #tpu.memory_space<vmem>>, %arg11: memref<32x32xf32, #tpu.memory_space<vmem>>, %arg12: memref<1x32xf32, #tpu.memory_space<vmem>>, %arg13: memref<32x128xf32, #tpu.memory_space<vmem>>, %arg14: memref<1x128xf32, #tpu.memory_space<vmem>>, %arg15: memref<2x128xf32, #tpu.memory_space<vmem>>, %arg16: memref<2x32xf32, #tpu.memory_space<vmem>>, %arg17: memref<2x32xf32, #tpu.memory_space<vmem>>) attributes {dimension_semantics = [#tpu.dimension_semantics<parallel>, #tpu.dimension_semantics<arbitrary>], iteration_bounds = array<i64: 1, 1>, scalar_prefetch = 0 : i64, scratch_operands = 2 : i64, tpu.core_type = #tpu.core_type<tc>, window_params = [{transform_indices = @transform_0, window_bounds = array<i64: 2, 16, 32>}, {transform_indices = @transform_1, window_bounds = array<i64: 2, 16>}, {transform_indices = @transform_2, window_bounds = array<i64: 2, 16, 32>}, {transform_indices = @transform_3, window_bounds = array<i64: 2, 16>}, {transform_indices = @transform_4, window_bounds = array<i64: 2, 16>}, {transform_indices = @transform_5, window_bounds = array<i64: 2, 1>}, {transform_indices = @transform_6, window_bounds = array<i64: 2, 1>}, {pipeline_mode = #tpu.pipeline_mode<synchronous>, transform_indices = @transform_7, window_bounds = array<i64: 32, 32>}, {pipeline_mode = #tpu.pipeline_mode<synchronous>, transform_indices = @transform_8, window_bounds = array<i64: 16, 32>}, {pipeline_mode = #tpu.pipeline_mode<synchronous>, transform_indices = @transform_9, window_bounds = array<i64: 32, 32>}, {pipeline_mode = #tpu.pipeline_mode<synchronous>, transform_indices = @transform_10, window_bounds = array<i64: 1, 32>}, {pipeline_mode = #tpu.pipeline_mode<synchronous>, transform_indices = @transform_11, window_bounds = array<i64: 32, 128>}, {pipeline_mode = #tpu.pipeline_mode<synchronous>, transform_indices = @transform_12, window_bounds = array<i64: 1, 128>}, {transform_indices = @transform_13, window_bounds = array<i64: 2, 128>}]} {
    %c0_i32 = arith.constant 0 : i32
    %0 = arith.cmpi eq, %arg1, %c0_i32 : i32
    %1 = arith.extui %0 : i1 to i32
    %c0_i32_0 = arith.constant 0 : i32
    %2 = arith.cmpi ne, %1, %c0_i32_0 : i32
    scf.if %2 {
      %cst_21 = arith.constant 0.000000e+00 : f32
      %26 = vector.broadcast %cst_21 : f32 to vector<2x32xf32>
      %c0_22 = arith.constant 0 : index
      %c0_23 = arith.constant 0 : index
      %27 = vector.load %arg16[%c0_22, %c0_23] : memref<2x32xf32, #tpu.memory_space<vmem>>, vector<2x32xf32>
      tpu.vector_store %arg16[%c0_22, %c0_23], %26 {strides = array<i32>} : memref<2x32xf32, #tpu.memory_space<vmem>>, vector<2x32xf32>,
      %cst_24 = arith.constant 0.000000e+00 : f32
      %28 = vector.broadcast %cst_24 : f32 to vector<2x32xf32>
      %c0_25 = arith.constant 0 : index
      %c0_26 = arith.constant 0 : index
      %29 = vector.load %arg17[%c0_25, %c0_26] : memref<2x32xf32, #tpu.memory_space<vmem>>, vector<2x32xf32>
      tpu.vector_store %arg17[%c0_25, %c0_26], %28 {strides = array<i32>} : memref<2x32xf32, #tpu.memory_space<vmem>>, vector<2x32xf32>,
    } else {
    }
    %c0 = arith.constant 0 : index
    %c0_1 = arith.constant 0 : index
    %c0_2 = arith.constant 0 : index
    %3 = vector.load %arg2[%c0, %c0_1, %c0_2] : memref<2x16x32xbf16, #tpu.memory_space<vmem>>, vector<2x16x32xbf16>
    %4 = arith.extf %3 : vector<2x16x32xbf16> to vector<2x16x32xf32>
    %c0_3 = arith.constant 0 : index
    %c0_4 = arith.constant 0 : index
    %5 = vector.load %arg3[%c0_3, %c0_4] : memref<2x16xf32, #tpu.memory_space<vmem>>, vector<2x16xf32>
    %6 = vector.shape_cast %5 : vector<2x16xf32> to vector<2x16x1xf32>
    %c0_5 = arith.constant 0 : index
    %c0_6 = arith.constant 0 : index
    %7 = vector.load %arg16[%c0_5, %c0_6] : memref<2x32xf32, #tpu.memory_space<vmem>>, vector<2x32xf32>
    %8 = vector.broadcast %6 : vector<2x16x1xf32> to vector<2x16x32xf32>
    %9 = arith.mulf %4, %8 : vector<2x16x32xf32>
    %cst = arith.constant dense<0.000000e+00> : vector<2x32xf32>
    %10 = vector.multi_reduction <add>, %9, %cst [1] : vector<2x16x32xf32> to vector<2x32xf32>
    %11 = arith.addf %7, %10 : vector<2x32xf32>
    %c0_7 = arith.constant 0 : index
    %c0_8 = arith.constant 0 : index
    %12 = vector.load %arg16[%c0_7, %c0_8] : memref<2x32xf32, #tpu.memory_space<vmem>>, vector<2x32xf32>
    tpu.vector_store %arg16[%c0_7, %c0_8], %11 {strides = array<i32>} : memref<2x32xf32, #tpu.memory_space<vmem>>, vector<2x32xf32>,
    %c0_9 = arith.constant 0 : index
    %c0_10 = arith.constant 0 : index
    %c0_11 = arith.constant 0 : index
    %13 = vector.load %arg4[%c0_9, %c0_10, %c0_11] : memref<2x16x32xbf16, #tpu.memory_space<vmem>>, vector<2x16x32xbf16>
    %14 = arith.extf %13 : vector<2x16x32xbf16> to vector<2x16x32xf32>
    %c0_12 = arith.constant 0 : index
    %c0_13 = arith.constant 0 : index
    %15 = vector.load %arg5[%c0_12, %c0_13] : memref<2x16xf32, #tpu.memory_space<vmem>>, vector<2x16xf32>
    %16 = vector.shape_cast %15 : vector<2x16xf32> to vector<2x16x1xf32>
    %c0_14 = arith.constant 0 : index
    %c0_15 = arith.constant 0 : index
    %17 = vector.load %arg17[%c0_14, %c0_15] : memref<2x32xf32, #tpu.memory_space<vmem>>, vector<2x32xf32>
    %18 = vector.broadcast %16 : vector<2x16x1xf32> to vector<2x16x32xf32>
    %19 = arith.mulf %14, %18 : vector<2x16x32xf32>
    %cst_16 = arith.constant dense<0.000000e+00> : vector<2x32xf32>
    %20 = vector.multi_reduction <add>, %19, %cst_16 [1] : vector<2x16x32xf32> to vector<2x32xf32>
    %21 = arith.addf %17, %20 : vector<2x32xf32>
    %c0_17 = arith.constant 0 : index
    %c0_18 = arith.constant 0 : index
    %22 = vector.load %arg17[%c0_17, %c0_18] : memref<2x32xf32, #tpu.memory_space<vmem>>, vector<2x32xf32>
    tpu.vector_store %arg17[%c0_17, %c0_18], %21 {strides = array<i32>} : memref<2x32xf32, #tpu.memory_space<vmem>>, vector<2x32xf32>,
    %c0_i32_19 = arith.constant 0 : i32
    %23 = arith.cmpi eq, %arg1, %c0_i32_19 : i32
    %24 = arith.extui %23 : i1 to i32
    %c0_i32_20 = arith.constant 0 : i32
    %25 = arith.cmpi ne, %24, %c0_i32_20 : i32
    scf.if %25 {
      %c0_21 = arith.constant 0 : index
      %c0_22 = arith.constant 0 : index
      %26 = vector.load %arg16[%c0_21, %c0_22] : memref<2x32xf32, #tpu.memory_space<vmem>>, vector<2x32xf32>
      %c0_23 = arith.constant 0 : index
      %c0_24 = arith.constant 0 : index
      %27 = vector.load %arg7[%c0_23, %c0_24] : memref<2x1xf32, #tpu.memory_space<vmem>>, vector<2x1xf32>
      %28 = vector.broadcast %27 : vector<2x1xf32> to vector<2x32xf32>
      %29 = arith.divf %26, %28 : vector<2x32xf32>
      %c0_25 = arith.constant 0 : index
      %c0_26 = arith.constant 0 : index
      %30 = vector.load %arg17[%c0_25, %c0_26] : memref<2x32xf32, #tpu.memory_space<vmem>>, vector<2x32xf32>
      %c0_27 = arith.constant 0 : index
      %c0_28 = arith.constant 0 : index
      %31 = vector.load %arg8[%c0_27, %c0_28] : memref<2x1xf32, #tpu.memory_space<vmem>>, vector<2x1xf32>
      %32 = vector.broadcast %31 : vector<2x1xf32> to vector<2x32xf32>
      %33 = arith.divf %30, %32 : vector<2x32xf32>
      %c0_29 = arith.constant 0 : index
      %c0_30 = arith.constant 0 : index
      %34 = vector.load %arg9[%c0_29, %c0_30] : memref<32x32xf32, #tpu.memory_space<vmem>>, vector<32x32xf32>
      %cst_31 = arith.constant dense<0.000000e+00> : vector<2x32xf32>
      %35 = tpu.matmul %29, %34, %cst_31 {dimension_numbers = #tpu.dot_dimension_numbers<[1], [0], [0], [1], [0, 0, 1, 1], [], []>} : vector<2x32xf32>, vector<32x32xf32>, vector<2x32xf32> -> vector<2x32xf32>
      %c0_32 = arith.constant 0 : index
      %c0_33 = arith.constant 0 : index
      %36 = vector.load %arg6[%c0_32, %c0_33] : memref<2x16xf32, #tpu.memory_space<vmem>>, vector<2x16xf32>
      %c0_34 = arith.constant 0 : index
      %c0_35 = arith.constant 0 : index
      %37 = vector.load %arg10[%c0_34, %c0_35] : memref<16x32xf32, #tpu.memory_space<vmem>>, vector<16x32xf32>
      %cst_36 = arith.constant dense<0.000000e+00> : vector<2x32xf32>
      %38 = tpu.matmul %36, %37, %cst_36 {dimension_numbers = #tpu.dot_dimension_numbers<[1], [0], [0], [1], [0, 0, 1, 1], [], []>} : vector<2x16xf32>, vector<16x32xf32>, vector<2x32xf32> -> vector<2x32xf32>
      %39 = arith.addf %35, %38 : vector<2x32xf32>
      %c0_37 = arith.constant 0 : index
      %c0_38 = arith.constant 0 : index
      %40 = vector.load %arg11[%c0_37, %c0_38] : memref<32x32xf32, #tpu.memory_space<vmem>>, vector<32x32xf32>
      %cst_39 = arith.constant dense<0.000000e+00> : vector<2x32xf32>
      %41 = tpu.matmul %33, %40, %cst_39 {dimension_numbers = #tpu.dot_dimension_numbers<[1], [0], [0], [1], [0, 0, 1, 1], [], []>} : vector<2x32xf32>, vector<32x32xf32>, vector<2x32xf32> -> vector<2x32xf32>
      %42 = arith.addf %39, %41 : vector<2x32xf32>
      %c0_40 = arith.constant 0 : index
      %c0_41 = arith.constant 0 : index
      %43 = vector.load %arg12[%c0_40, %c0_41] : memref<1x32xf32, #tpu.memory_space<vmem>>, vector<1x32xf32>
      %44 = vector.broadcast %43 : vector<1x32xf32> to vector<2x32xf32>
      %45 = arith.addf %42, %44 : vector<2x32xf32>
      %cst_42 = arith.constant 0.000000e+00 : f32
      %46 = vector.broadcast %cst_42 : f32 to vector<2x32xf32>
      %47 = arith.maximumf %45, %46 : vector<2x32xf32>
      %c0_43 = arith.constant 0 : index
      %c0_44 = arith.constant 0 : index
      %48 = vector.load %arg13[%c0_43, %c0_44] : memref<32x128xf32, #tpu.memory_space<vmem>>, vector<32x128xf32>
      %cst_45 = arith.constant dense<0.000000e+00> : vector<2x128xf32>
      %49 = tpu.matmul %47, %48, %cst_45 {dimension_numbers = #tpu.dot_dimension_numbers<[1], [0], [0], [1], [0, 0, 1, 1], [], []>} : vector<2x32xf32>, vector<32x128xf32>, vector<2x128xf32> -> vector<2x128xf32>
      %c0_46 = arith.constant 0 : index
      %c0_47 = arith.constant 0 : index
      %50 = vector.load %arg14[%c0_46, %c0_47] : memref<1x128xf32, #tpu.memory_space<vmem>>, vector<1x128xf32>
      %51 = vector.broadcast %50 : vector<1x128xf32> to vector<2x128xf32>
      %52 = arith.addf %49, %51 : vector<2x128xf32>
      %c0_48 = arith.constant 0 : index
      %c0_49 = arith.constant 0 : index
      %53 = vector.load %arg15[%c0_48, %c0_49] : memref<2x128xf32, #tpu.memory_space<vmem>>, vector<2x128xf32>
      tpu.vector_store %arg15[%c0_48, %c0_49], %52 {strides = array<i32>} : memref<2x128xf32, #tpu.memory_space<vmem>>, vector<2x128xf32>,
    } else {
    }
    return
  }
  func.func @transform_0(%arg0: i32, %arg1: i32) -> (i32, i32, i32) {
    %c0_i32 = arith.constant 0 : i32
    %c0_i32_0 = arith.constant 0 : i32
    return %arg0, %arg1, %c0_i32 : i32, i32, i32
  }
  func.func @transform_1(%arg0: i32, %arg1: i32) -> (i32, i32) {
    %c0_i32 = arith.constant 0 : i32
    return %arg0, %arg1 : i32, i32
  }
  func.func @transform_2(%arg0: i32, %arg1: i32) -> (i32, i32, i32) {
    %c0_i32 = arith.constant 0 : i32
    %c0_i32_0 = arith.constant 0 : i32
    return %arg0, %arg1, %c0_i32 : i32, i32, i32
  }
  func.func @transform_3(%arg0: i32, %arg1: i32) -> (i32, i32) {
    %c0_i32 = arith.constant 0 : i32
    return %arg0, %arg1 : i32, i32
  }
  func.func @transform_4(%arg0: i32, %arg1: i32) -> (i32, i32) {
    %c0_i32 = arith.constant 0 : i32
    %c0_i32_0 = arith.constant 0 : i32
    return %arg0, %c0_i32 : i32, i32
  }
  func.func @transform_5(%arg0: i32, %arg1: i32) -> (i32, i32) {
    %c0_i32 = arith.constant 0 : i32
    %c0_i32_0 = arith.constant 0 : i32
    return %arg0, %c0_i32 : i32, i32
  }
  func.func @transform_6(%arg0: i32, %arg1: i32) -> (i32, i32) {
    %c0_i32 = arith.constant 0 : i32
    %c0_i32_0 = arith.constant 0 : i32
    return %arg0, %c0_i32 : i32, i32
  }
  func.func @transform_7(%arg0: i32, %arg1: i32) -> (i32, i32) {
    %c0_i32 = arith.constant 0 : i32
    %c0_i32_0 = arith.constant 0 : i32
    %c0_i32_1 = arith.constant 0 : i32
    return %c0_i32, %c0_i32_0 : i32, i32
  }
  func.func @transform_8(%arg0: i32, %arg1: i32) -> (i32, i32) {
    %c0_i32 = arith.constant 0 : i32
    %c0_i32_0 = arith.constant 0 : i32
    %c0_i32_1 = arith.constant 0 : i32
    return %c0_i32, %c0_i32_0 : i32, i32
  }
  func.func @transform_9(%arg0: i32, %arg1: i32) -> (i32, i32) {
    %c0_i32 = arith.constant 0 : i32
    %c0_i32_0 = arith.constant 0 : i32
    %c0_i32_1 = arith.constant 0 : i32
    return %c0_i32, %c0_i32_0 : i32, i32
  }
  func.func @transform_10(%arg0: i32, %arg1: i32) -> (i32, i32) {
    %c0_i32 = arith.constant 0 : i32
    %c0_i32_0 = arith.constant 0 : i32
    %c0_i32_1 = arith.constant 0 : i32
    return %c0_i32, %c0_i32_0 : i32, i32
  }
  func.func @transform_11(%arg0: i32, %arg1: i32) -> (i32, i32) {
    %c0_i32 = arith.constant 0 : i32
    %c0_i32_0 = arith.constant 0 : i32
    %c0_i32_1 = arith.constant 0 : i32
    return %c0_i32, %c0_i32_0 : i32, i32
  }
  func.func @transform_12(%arg0: i32, %arg1: i32) -> (i32, i32) {
    %c0_i32 = arith.constant 0 : i32
    %c0_i32_0 = arith.constant 0 : i32
    %c0_i32_1 = arith.constant 0 : i32
    return %c0_i32, %c0_i32_0 : i32, i32
  }
  func.func @transform_13(%arg0: i32, %arg1: i32) -> (i32, i32) {
    %c0_i32 = arith.constant 0 : i32
    %c0_i32_0 = arith.constant 0 : i32
    return %arg0, %c0_i32 : i32, i32
  }
}

</mosaic_0001>

<bundles_post_ra>
// kernel: tpu_custom_call.1
= control target key start
LH: loop header
LB: loop body
LE: loop exit
PB: predicated region body
PF: predicated region fallthrough
CT: control target
= control target key end

     0   :  { %18 = vsyncpa [#allocation5], 0  ;;  %s1214_s0 = inlined_call_operand.hbm [shape: bf16[2,16,32], index: 0, kind: input, shape index: {}]   ;;  %s1215_s1 = inlined_call_operand.vmem [shape: f32[2,16], index: 1, kind: input, shape index: {}]   ;;  %s1216_s2 = inlined_call_operand.hbm [shape: bf16[2,16,32], index: 2, kind: input, shape index: {}]   ;;  %s1217_s3 = inlined_call_operand.hbm [shape: f32[2,16], index: 3, kind: input, shape index: {}]   ;;  %s1218_s4 = inlined_call_operand.hbm [shape: f32[2,16], index: 4, kind: input, shape index: {}]   ;;  %s1219_s5 = inlined_call_operand.vmem [shape: f32[2,1], index: 5, kind: input, shape index: {}]   ;;  %s1220_s6 = inlined_call_operand.vmem [shape: f32[2,1], index: 6, kind: input, shape index: {}]   ;;  %s1221_s7 = inlined_call_operand.vmem [shape: f32[32,32], index: 7, kind: input, shape index: {}]   ;;  %s1222_s8 = inlined_call_operand.hbm [shape: f32[16,32], index: 8, kind: input, shape index: {}]   ;;  %s1223_s9 = inlined_call_operand.hbm [shape: f32[32,32], index: 9, kind: input, shape index: {}]   ;;  %s1224_s10 = inlined_call_operand.vmem [shape: f32[1,32], index: 10, kind: input, shape index: {}]   ;;  %s1225_s11 = inlined_call_operand.hbm [shape: f32[32,128], index: 11, kind: input, shape index: {}]   ;;  %s1226_s12 = inlined_call_operand.vmem [shape: f32[1,128], index: 12, kind: input, shape index: {}]   ;;  %s1227_s13 = inlined_call_operand.hbm [shape: f32[2,128], index: 13, kind: output, shape index: {}]  }
   0x1   :  { %19 = vsyncpa [#allocation8], 0 }
   0x2   :  { %20 = vsyncpa [#allocation11], 0 }
   0x3   :  { %21 = vsyncpa [#allocation14], 0 }
   0x4   :  { %22 = vsyncpa [#allocation6], 0  ;;  %s942_s25 = smov [#allocation7]   ;;  %s943_s27 = smov [#allocation10]  }
   0x5   :  { %s42_s26 = sshll.u32 %s942_s25, 4  ;;  %s65_s28 = sshll.u32 %s943_s27, 4  ;;  %s43_s26 = int_to_ptr.vmem [resolvable:$true] %s42_s26  ;;  %s66_s28 = int_to_ptr.vmem [resolvable:$true] %s65_s28 }
   0x6   :  { %s756_s14 = scalar_lea.hbm %s1216_s2, 256 }
   0x7   :  { %p757_p0 = scmp.ne.s32.totalorder %s1216_s2, %s756_s14  ;;  %p760_p1 = scmp.lt.u32.totalorder %s756_s14, %s1216_s2 }
   0x9   :  { %p762_p2 = pnand %p760_p1, %p757_p0 }
   0xb   :  { %765 = shalt.err (!%p762_p2)
}
   0xc   :  { %s766_s19 = scalar_lea.vmem %s43_s26, 256  ;;  %p771_p4 = scmp.lt.s32.totalorder %s43_s26, %s43_s26 }
   0xd   :  { %p767_p3 = scmp.ne.s32.totalorder %s43_s26, %s766_s19  ;;  %p772_p5 = scmp.lt.s32.totalorder %s766_s19, %s766_s19 }
   0xf   :  { %p773_p6 = por %p772_p5, %p771_p4 }
  0x11   :  { %p774_p7 = pnand %p773_p6, %p767_p3 }
  0x13   :  { %777 = shalt.err (!%p774_p7)
}
  0x14   :  { %s944_s20 = smov 64   ;;  %s945_s21 = smov 4  }
  0x15   :  { %48 = dma.hbm_to_vmem [thread:$0]  %s1216_s2, 256, %s43_s26, [#allocation8], %s944_s20, %s944_s20, %s945_s21  }
  0x16   :  { %s778_s27 = scalar_lea.hbm %s1218_s4, 32 }
  0x17   :  { %p779_p8 = scmp.ne.s32.totalorder %s1218_s4, %s778_s27  ;;  %p782_p9 = scmp.lt.u32.totalorder %s778_s27, %s1218_s4 }
  0x19   :  { %p784_p10 = pnand %p782_p9, %p779_p8 }
  0x1b   :  { %787 = shalt.err (!%p784_p10)
}
  0x1c   :  { %s788_s16 = scalar_lea.vmem %s66_s28, 32  ;;  %p793_p12 = scmp.lt.s32.totalorder %s66_s28, %s66_s28 }
  0x1d   :  { %p789_p11 = scmp.ne.s32.totalorder %s66_s28, %s788_s16  ;;  %p794_p13 = scmp.lt.s32.totalorder %s788_s16, %s788_s16 }
  0x1f   :  { %p795_p0 = por %p794_p13, %p793_p12 }
  0x21   :  { %p796_p1 = pnand %p795_p0, %p789_p11 }
  0x23   :  { %799 = shalt.err (!%p796_p1)
}
  0x24   :  { %68 = dma.hbm_to_vmem [thread:$0]  %s1218_s4, 32, %s66_s28, [#allocation11]  }
  0x25   :  { %s946_s17 = smov [#allocation13]   ;;  %s947_s19 = smov [#allocation4]  }
  0x26   :  { %s92_s18 = sshll.u32 %s946_s17, 4  ;;  %s28_s22 = sshll.u32 %s947_s19, 4  ;;  %s93_s18 = int_to_ptr.vmem [resolvable:$true] %s92_s18  ;;  %s1055_s22 = int_to_ptr.vmem [resolvable:$true] %s28_s22 }
  0x27   :  { %s800_s25 = scalar_lea.hbm %s1223_s9, 512 }
  0x28   :  { %p801_p2 = scmp.ne.s32.totalorder %s1223_s9, %s800_s25  ;;  %p804_p3 = scmp.lt.u32.totalorder %s800_s25, %s1223_s9 }
  0x2a   :  { %p806_p4 = pnand %p804_p3, %p801_p2 }
  0x2c   :  { %809 = shalt.err (!%p806_p4)
}
  0x2d   :  { %s810_s4 = scalar_lea.vmem %s93_s18, 512  ;;  %p815_p6 = scmp.lt.s32.totalorder %s93_s18, %s93_s18 }
  0x2e   :  { %p811_p5 = scmp.ne.s32.totalorder %s93_s18, %s810_s4  ;;  %p816_p7 = scmp.lt.s32.totalorder %s810_s4, %s810_s4 }
  0x30   :  { %p817_p8 = por %p816_p7, %p815_p6 }
  0x32   :  { %p818_p9 = pnand %p817_p8, %p811_p5 }
  0x34   :  { %821 = shalt.err (!%p818_p9)
}
  0x35   :  { %s948_s28 = smov 128   ;;  %s949_s15 = smov 8  }
  0x36   :  { %98 = dma.hbm_to_vmem [thread:$0]  %s1223_s9, 512, %s93_s18, [#allocation14], %s948_s28, %s948_s28, %s949_s15  }
  0x37   :  { %s822_s19 = scalar_lea.hbm %s1214_s0, 256 }
  0x38   :  { %p823_p10 = scmp.ne.s32.totalorder %s1214_s0, %s822_s19  ;;  %p826_p11 = scmp.lt.u32.totalorder %s822_s19, %s1214_s0 }
  0x3a   :  { %p828_p12 = pnand %p826_p11, %p823_p10 }
  0x3c   :  { %831 = shalt.err (!%p828_p12)
}
  0x3d   :  { %s832_s29 = scalar_lea.vmem %s1055_s22, 256  ;;  %p837_p0 = scmp.lt.s32.totalorder %s1055_s22, %s1055_s22 }
  0x3e   :  { %p833_p13 = scmp.ne.s32.totalorder %s1055_s22, %s832_s29  ;;  %p838_p1 = scmp.lt.s32.totalorder %s832_s29, %s832_s29 }
  0x40   :  { %p839_p2 = por %p838_p1, %p837_p0 }
  0x42   :  { %p840_p3 = pnand %p839_p2, %p833_p13 }
  0x44   :  { %843 = shalt.err (!%p840_p3)
}
  0x45   :  { %34 = dma.hbm_to_vmem [thread:$0]  %s1214_s0, 256, %s1055_s22, [#allocation5], %s944_s20, %s944_s20, %s945_s21  }
  0x46   :  { %s950_s30 = smov [#allocation9]   ;;  %s951_s4 = smov [#allocation12]  }
  0x47   :  { %s55_s14 = sshll.u32 %s950_s30, 4  ;;  %s80_s16 = sshll.u32 %s951_s4, 4  ;;  %s56_s14 = int_to_ptr.vmem [resolvable:$true] %s55_s14  ;;  %s1092_s16 = int_to_ptr.vmem [resolvable:$true] %s80_s16 }
  0x48   :  { %s844_s17 = scalar_lea.hbm %s1217_s3, 32 }
  0x49   :  { %p845_p4 = scmp.ne.s32.totalorder %s1217_s3, %s844_s17  ;;  %p848_p5 = scmp.lt.u32.totalorder %s844_s17, %s1217_s3 }
  0x4b   :  { %p850_p6 = pnand %p848_p5, %p845_p4 }
  0x4d   :  { %853 = shalt.err (!%p850_p6)
}
  0x4e   :  { %s854_s0 = scalar_lea.vmem %s56_s14, 32  ;;  %p859_p8 = scmp.lt.s32.totalorder %s56_s14, %s56_s14 }
  0x4f   :  { %p855_p7 = scmp.ne.s32.totalorder %s56_s14, %s854_s0  ;;  %p860_p9 = scmp.lt.s32.totalorder %s854_s0, %s854_s0 }
  0x51   :  { %p861_p10 = por %p860_p9, %p859_p8 }
  0x53   :  { %p862_p11 = pnand %p861_p10, %p855_p7 }
  0x55   :  { %865 = shalt.err (!%p862_p11)
}
  0x56   :  { %58 = dma.hbm_to_vmem [thread:$0]  %s1217_s3, 32, %s56_s14, [#allocation8]  }
  0x57   :  { %s866_s29 = scalar_lea.hbm %s1222_s8, 256 }
  0x58   :  { %p867_p12 = scmp.ne.s32.totalorder %s1222_s8, %s866_s29  ;;  %p870_p13 = scmp.lt.u32.totalorder %s866_s29, %s1222_s8 }
  0x5a   :  { %p872_p0 = pnand %p870_p13, %p867_p12 }
  0x5c   :  { %875 = shalt.err (!%p872_p0)
}
  0x5d   :  { %s876_s2 = scalar_lea.vmem %s1092_s16, 256  ;;  %p881_p2 = scmp.lt.s32.totalorder %s1092_s16, %s1092_s16 }
  0x5e   :  { %p877_p1 = scmp.ne.s32.totalorder %s1092_s16, %s876_s2  ;;  %p882_p3 = scmp.lt.s32.totalorder %s876_s2, %s876_s2 }
  0x60   :  { %p883_p4 = por %p882_p3, %p881_p2 }
  0x62   :  { %p884_p5 = pnand %p883_p4, %p877_p1 }
  0x64   :  { %887 = shalt.err (!%p884_p5)
}
  0x65   :  { %86 = dma.hbm_to_vmem [thread:$0]  %s1222_s8, 256, %s1092_s16, [#allocation11], %s948_s28, %s948_s28, %s949_s15  }
  0x66   :  { %s952_s26 = smov [#allocation15]   ;;  %s888_s24 = scalar_lea.hbm %s1225_s11, 512 }
  0x67   :  { %s106_s17 = sshll.u32 %s952_s26, 4  ;;  %p889_p6 = scmp.ne.s32.totalorder %s1225_s11, %s888_s24  ;;  %s107_s17 = int_to_ptr.vmem [resolvable:$true] %s106_s17 }
  0x68   :  { %p892_p7 = scmp.lt.u32.totalorder %s888_s24, %s1225_s11 }
  0x6a   :  { %p894_p8 = pnand %p892_p7, %p889_p6 }
  0x6c   :  { %897 = shalt.err (!%p894_p8)
}
  0x6d   :  { %s898_s22 = scalar_lea.vmem %s107_s17, 512  ;;  %p903_p10 = scmp.lt.s32.totalorder %s107_s17, %s107_s17 }
  0x6e   :  { %p899_p9 = scmp.ne.s32.totalorder %s107_s17, %s898_s22  ;;  %p904_p11 = scmp.lt.s32.totalorder %s898_s22, %s898_s22 }
  0x70   :  { %p905_p12 = por %p904_p11, %p903_p10 }
  0x72   :  { %p906_p13 = pnand %p905_p12, %p899_p9 }
  0x74   :  { %909 = shalt.err (!%p906_p13)
}
  0x75   :  { %112 = dma.hbm_to_vmem [thread:$0]  %s1225_s11, 512, %s107_s17, [#allocation14], %s948_s28, %s948_s28, %s949_s15  }
  0x76   :  { %932 = dma.done.wait [#allocation5], 256  }
  0x77   :  { %933 = vsyncadd [#allocation5], 4294967040 }
  0x78   :  { %934 = dma.done.wait [#allocation8], 288  }
  0x79   :  { %935 = vsyncadd [#allocation8], 4294967008 }
  0x7a   :  { %936 = dma.done.wait [#allocation11], 288  }
  0x7b   :  { %937 = vsyncadd [#allocation11], 4294967008 }
  0x7c   :  { %938 = dma.done.wait [#allocation14], 1024  }
  0x7d   :  { %939 = vsyncadd [#allocation14], 4294966272  ;;  %v152_v0 = vlaneseq  ;;  %v953_v1 = vmov 0   ;;  %v151_v5 = vld [vmem:[%s1215_s1] sm:$0x3]  ;;  %vm140_vm0 = vcmask 254976  }
  0x7e   :  { %751 = vset.pattern.permute.xlu1 %v953_v1  ;;  %750 = vset.pattern.permute.xlu0 %v953_v1  ;;  %v214_v8 = vld [vmem:[#allocation9] sm:$0x3]  ;;  %v954_v9 = vmov 0.0   ;;  %v279_v12 = vld [vmem:[%s1220_s6] sm:$0x3]  ;;  %v292_v14 = vld [vmem:[#allocation12] sm:$0xff] }
  0x7f   :  { %v153_v2 = vshrl.u32 %v152_v0, 7  ;;  %141 = vst.msk [vmem:[#allocation2] sm:$0x3] %vm140_vm0, %v954_v9  ;;  %142 = vst.msk [vmem:[#allocation3] sm:$0x3] %vm140_vm0, %v954_v9  ;;  %v293_v15 = vld [vmem:[#allocation12 + $0x8] sm:$0xff] }
  0x80   :  { %v270_v13 = vld [vmem:[%s1219_s5] sm:$0x3]  ;;  %v714_v16 = vpack.c.bf16 %v293_v15, %v292_v14  ;;  %v955_v17 = vmov 0.0|0.0   ;;  %v291_v18 = vld [vmem:[#allocation10] sm:$0x3]  ;;  %vm294_vm1 = vcmask 130048  }
  0x81   :  { %v165_v3 = vsub.s32 1, %v153_v2  ;;  %v154_v4 = vsub.s32 0, %v153_v2  ;;  %713 = vmatprep.subr.bf16.mxu0 %v955_v17  ;;  %716 = vmatprep.subr.bf16.mxu1 %v955_v17  ;;  %v287_v19 = vld [vmem:[%s1221_s7] sm:$0xff]  ;;  %v288_v20 = vld [vmem:[%s1221_s7 + $0x8] sm:$0xff]  ;;  %vm956_vm2 = vmmov 0   ;;  %v441_v22 = vld [vmem:[#allocation13] sm:$0xff] }
  0x82   :  { %715 = vmatpush3.bf16.msra.mxu0 %v714_v16  ;;  %677 = vmatprep.mubr.msk.f32.mxu0 %vm956_vm2, %v954_v9  ;;  %v717_v21 = vpack.c.bf16 %v288_v20, %v287_v19  ;;  %v442_v23 = vld [vmem:[#allocation13 + $0x8] sm:$0xff]  ;;  %v289_v24 = vld [vmem:[%s1221_s7 + $0x10] sm:$0xff]  ;;  %v290_v26 = vld [vmem:[%s1221_s7 + $0x18] sm:$0xff]  ;;  %vm179_vm3 = vcmask 261120   ;;  %vm200_vm4 = vcmask 1041409   ;;  %s957_s19 = smov [#allocation16]  }
  0x83   :  { %v166_v6 = vrot.slane %v151_v5, %v165_v3  ;;  %v155_v7 = vrot.slane %v151_v5, %v154_v4  ;;  %v218_v10 = vrot.slane %v214_v8, %v154_v4  ;;  %v229_v11 = vrot.slane %v214_v8, %v165_v3  ;;  %722 = vmatprep.subr.bf16.mxu0 %v955_v17  ;;  %v443_v27 = vld [vmem:[#allocation13 + $0x10] sm:$0xff]  ;;  %v444_v28 = vld [vmem:[#allocation13 + $0x18] sm:$0xff]  ;;  %v654_v48 = vld [vmem:[#allocation7 + $0x8] sm:$0xff]   ;;  %s619_s23 = sshll.u32 %s957_s19, 4  ;;  %s620_s23 = int_to_ptr.vmem [resolvable:$true] %s619_s23 }
  0x84   :  { %v723_v25 = vpack.c.bf16 %v442_v23, %v441_v22  ;;  %688 = vmatprep.mubr.msk.f32.mxu1 %vm956_vm2, %v954_v9  ;;  %718 = vmatpush3.bf16.msra.mxu1 %v717_v21  ;;  %v720_v29 = vpack.c.bf16 %v290_v26, %v289_v24  ;;  %v726_v30 = vpack.c.bf16 %v444_v28, %v443_v27  ;;  %v653_v31 = vld [vmem:[#allocation4 + $0x8] sm:$0xff]   ;;  %v638_v32 = vld [vmem:[#allocation4] sm:$0xff]   ;;  %v646_v39 = vld [vmem:[#allocation7] sm:$0xff]   ;;  %v652_v59 = vunpack.c.h.bf16 %v654_v48  ;;  %s910_s24 = scalar_lea.vmem %s620_s23, 32  ;;  %p915_p1 = scmp.lt.s32.totalorder %s620_s23, %s620_s23 }
  0x85   :  { %168 = vbcast.lane.b32.xlu1 %v166_v6, 256  ;;  %157 = vbcast.lane.b32.xlu0 %v155_v7, 256  ;;  %v643_v33 = vunpack.c.l.bf16 %v653_v31  ;;  %v639_v34 = vunpack.c.l.bf16 %v638_v32  ;;  %v644_v37 = vunpack.c.h.bf16 %v653_v31  ;;  %v640_v38 = vunpack.c.h.bf16 %v638_v32  ;;  %p911_p0 = scmp.ne.s32.totalorder %s620_s23, %s910_s24  ;;  %p916_p2 = scmp.lt.s32.totalorder %s910_s24, %s910_s24 }
  0x86   :  { %678 = vmatmul.mubr.msk.f32.vlgmr.msra.gmra.mrb[0].mxu0 %vm294_vm1, %v291_v18  ;;  %719 = vmatprep.subr.bf16.mxu1 %v955_v17  ;;  %v648_v46 = vunpack.c.h.bf16 %v646_v39  ;;  %v647_v47 = vunpack.c.l.bf16 %v646_v39  ;;  %v651_v60 = vunpack.c.l.bf16 %v654_v48  ;;  %v174_v27 = vld [vmem:[#allocation2] sm:$0x3] }
  0x87   :  { %724 = vmatpush3.bf16.msra.mxu0 %v723_v25  ;;  %699 = vmatprep.mubr.msk.f32.mxu0 %vm956_vm2, %v954_v9  ;;  %p917_p3 = por %p916_p2, %p915_p1 }
  0x88   :  { %725 = vmatprep.subr.bf16.mxu0 %v955_v17  ;;  %721 = vmatpush3.bf16.msra.mxu1 %v720_v29 }
  0x89   :  { %172 = vbcast.lane.b32.xlu1 %v166_v6, 264  ;;  %161 = vbcast.lane.b32.xlu0 %v155_v7, 264  ;;  %p918_p4 = pnand %p917_p3, %p911_p0 }
  0x8a   :  { %728 = vmatprep.subr.bf16.mxu1 %v955_v17 }
  0x8b   :  { %727 = vmatpush3.bf16.msra.mxu0 %v726_v30 }
  0x8d   :  { %224 = vbcast.lane.b32.xlu1 %v218_v10, 264  ;;  %220 = vbcast.lane.b32.xlu0 %v218_v10, 256 }
  0x91   :  { %235 = vbcast.lane.b32.xlu1 %v229_v11, 264  ;;  %231 = vbcast.lane.b32.xlu0 %v229_v11, 256 }
  0x95   :  { %282 = vperm.xlu1 %751, %v279_v12   ;;  %273 = vperm.xlu0 %750, %v270_v13  }
  0xf7   :  { %v169_v35 = vpop.permute.xlu1 %168  ;;  %v158_v36 = vpop.permute.xlu0 %157 }
  0xf8   :  { %v177_v40 = vmul.f32 %v643_v33, %v169_v35  ;;  %v175_v41 = vmul.f32 %v639_v34, %v158_v36  ;;  %v237_v36 = vld [vmem:[#allocation3] sm:$0x3] }
  0xfa   :  { %v189_v49 = vsel %vm179_vm3, %v177_v40, 0.0  ;;  %v180_v50 = vsel %vm179_vm3, %v175_v41, 0.0 }
  0xfb   :  { %v173_v42 = vpop.permute.xlu1 %172  ;;  %v162_v43 = vpop.permute.xlu0 %161 }
  0xfc   :  { %v178_v44 = vmul.f32 %v644_v37, %v173_v42  ;;  %v176_v45 = vmul.f32 %v640_v38, %v162_v43 }
  0xfe   :  { %v190_v51 = vsel %vm179_vm3, %v178_v44, 0.0  ;;  %v181_v52 = vsel %vm179_vm3, %v176_v45, 0.0 }
  0xff   :  { %v191_v53 = vadd.f32 %v190_v51, %v189_v49  ;;  %v182_v54 = vadd.f32 %v181_v52, %v180_v50  ;;  %v225_v55 = vpop.permute.xlu1 %224  ;;  %v221_v56 = vpop.permute.xlu0 %220  ;;  %v528_v49 = vld [vmem:[#allocation15] sm:$0xff]  ;;  %v529_v50 = vld [vmem:[#allocation15 + $0x8] sm:$0xff]  ;;  %v530_v52 = vld [vmem:[#allocation15 + $0x10] sm:$0xff] }
 0x100   :  { %v239_v57 = vmul.f32 %v648_v46, %v225_v55  ;;  %v238_v58 = vmul.f32 %v647_v47, %v221_v56  ;;  %v729_v51 = vpack.c.bf16 %v529_v50, %v528_v49 }
 0x101   :  { %v192_v61 = vrot.slane %v191_v53, 4  ;;  %v183_v62 = vrot.slane %v182_v54, 4 }
 0x102   :  { %v243_v63 = vsel %vm179_vm3, %v239_v57, 0.0  ;;  %v242_v0 = vsel %vm179_vm3, %v238_v58, 0.0 }
 0x103   :  { %v193_v1 = vadd.f32 %v192_v61, %v191_v53  ;;  %v184_v2 = vadd.f32 %v183_v62, %v182_v54  ;;  %v244_v3 = vadd.f32 %v243_v63, %v242_v0  ;;  %v236_v4 = vpop.permute.xlu1 %235  ;;  %v232_v5 = vpop.permute.xlu0 %231  ;;  %v531_v53 = vld [vmem:[#allocation15 + $0x18] sm:$0xff] }
 0x104   :  { %v241_v6 = vmul.f32 %v652_v59, %v236_v4  ;;  %v240_v7 = vmul.f32 %v651_v60, %v232_v5  ;;  %v732_v54 = vpack.c.bf16 %v531_v53, %v530_v52 }
 0x105   :  { %v194_v8 = vrot.slane %v193_v1, 2  ;;  %v185_v10 = vrot.slane %v184_v2, 2  ;;  %v245_v11 = vrot.slane %v244_v3, 4 }
 0x106   :  { %v252_v12 = vsel %vm179_vm3, %v241_v6, 0.0  ;;  %v251_v13 = vsel %vm179_vm3, %v240_v7, 0.0 }
 0x107   :  { %v195_v14 = vadd.f32 %v194_v8, %v193_v1  ;;  %v186_v15 = vadd.f32 %v185_v10, %v184_v2  ;;  %v246_v16 = vadd.f32 %v245_v11, %v244_v3  ;;  %v253_v18 = vadd.f32 %v252_v12, %v251_v13 }
 0x109   :  { %v196_v19 = vrot.slane %v195_v14, 1  ;;  %v187_v20 = vrot.slane %v186_v15, 1  ;;  %v247_v21 = vrot.slane %v246_v16, 2  ;;  %v254_v22 = vrot.slane %v253_v18, 4 }
 0x10b   :  { %v197_v23 = vadd.f32 %v196_v19, %v195_v14  ;;  %v188_v24 = vadd.f32 %v187_v20, %v186_v15  ;;  %v248_v25 = vadd.f32 %v247_v21, %v246_v16  ;;  %v255_v26 = vadd.f32 %v254_v22, %v253_v18 }
 0x10d   :  { %v201_v28 = vsel %vm200_vm4, %v197_v23, %v188_v24  ;;  %v256_v29 = vrot.slane %v255_v26, 2  ;;  %v249_v31 = vrot.slane %v248_v25, 1 }
 0x10e   :  { %v203_v30 = vadd.f32 %v201_v28, %v174_v27 }
 0x10f   :  { %v257_v32 = vadd.f32 %v256_v29, %v255_v26  ;;  %v250_v34 = vadd.f32 %v249_v31, %v248_v25 }
 0x110   :  { %205 = vst.msk [vmem:[#allocation2] sm:$0x3] %vm140_vm0, %v203_v30 }
 0x111   :  { %v258_v33 = vrot.slane %v257_v32, 1 }
 0x113   :  { %v259_v35 = vadd.f32 %v258_v33, %v257_v32 }
 0x114   :  { %v283_v37 = vpop.permute.xlu1 %282  ;;  %v274_v38 = vpop.permute.xlu0 %273 }
 0x115   :  { %v262_v39 = vsel %vm200_vm4, %v259_v35, %v250_v34  ;;  %752 = vrcp.f32 %v283_v37 }
 0x116   :  { %754 = vrcp.f32 %v274_v38  ;;  %v264_v40 = vadd.f32 %v262_v39, %v237_v36 }
 0x117   :  { %v269_v44 = vld [vmem:[#allocation2] sm:$0x3] }
 0x118   :  { %265 = vst.msk [vmem:[#allocation3] sm:$0x3] %vm140_vm0, %v264_v40 }
 0x11f   :  { %v753_v41 = vpop.eup %752  ;;  %v278_v42 = vld [vmem:[#allocation3] sm:$0x3] }
 0x120   :  { %v755_v43 = vpop.eup %754  ;;  %v286_v45 = vmul.f32 %v753_v41, %v278_v42 }
 0x121   :  { %v277_v46 = vmul.f32 %v755_v43, %v269_v44 }
 0x122   :  { %700 = vmatmul.mubr.msk.f32.vlgmr.msra.gmra.mrb[2].mxu0 %vm179_vm3, %v286_v45 }
 0x123   :  { %689 = vmatmul.mubr.msk.f32.vlgmr.msra.gmra.mrb[0].mxu1 %vm179_vm3, %v277_v46 }
 0x124   :  { %710 = vmatprep.mubr.msk.f32.mxu1 %vm956_vm2, %v954_v9  ;;  %730 = vmatpush3.bf16.msra.mxu1 %v729_v51  ;;  %v634_v9 = vld [vmem:[%s1224_s10] ss:$0 sm:$0xff] }
 0x125   :  { %731 = vmatprep.subr.bf16.mxu1 %v955_v17  ;;  %v635_v17 = vld [vmem:[%s1226_s12] ss:$0 sm:$0xff] }
 0x128   :  { %733 = vmatpush3.bf16.msra.mxu1 %v732_v54 }
 0x159   :  { %v364_v47 = vpop.f32.mrb[0].mxu0 }
 0x15a   :  { %v679_v48 = vpop.f32.mrb[1].mxu0 }
 0x1f5   :  { %v514_v55 = vpop.f32.mrb[2].mxu0 }
 0x1f6   :  { %v437_v56 = vpop.f32.mrb[0].mxu1  ;;  %v701_v57 = vpop.f32.mrb[3].mxu0 }
 0x1f7   :  { %v438_v58 = vadd.f32 %v437_v56, %v364_v47  ;;  %v690_v59 = vpop.f32.mrb[1].mxu1 }
 0x1f9   :  { %v518_v60 = vadd.f32 %v514_v55, %v438_v58 }
 0x1fb   :  { %v526_v61 = vadd.f32 %v634_v9, %v518_v60 }
 0x1fd   :  { %v527_v62 = vmax.f32 %v526_v61, 0.0 }
 0x1ff   :  { %711 = vmatmul.mubr.msk.f32.vlgmr.msra.gmra.mrb[2].mxu1 %vm179_vm3, %v527_v62 }
 0x2d2   :  { %v608_v63 = vpop.f32.mrb[2].mxu1 }
 0x2d3   :  { %v609_v0 = vadd.f32 %v635_v17, %v608_v63  ;;  %v712_v1 = vpop.f32.mrb[3].mxu1 }
 0x2d5   :  { %612 = vst [vmem:[#allocation16] sm:$0x3] %v609_v0 }
 0x2d6   :  { %921 = shalt.err (!%p918_p4)
}
 0x2d7   :  { %s922_s0 = scalar_lea.hbm %s1227_s13, 32 }
 0x2d8   :  { %p923_p5 = scmp.ne.s32.totalorder %s1227_s13, %s922_s0  ;;  %p926_p6 = scmp.lt.u32.totalorder %s922_s0, %s1227_s13 }
 0x2da   :  { %p928_p7 = pnand %p926_p6, %p923_p5 }
 0x2dc   :  { %931 = shalt.err (!%p928_p7)
}
 0x2dd   :  { %622 = dma.vmem_to_hbm [thread:$0]  %s620_s23, 32, %s1227_s13, [#allocation6]  }
 0x2de   :  { %940 = dma.done.wait [#allocation6], 32  }
 0x2df   :  { %941 = vsyncadd [#allocation6], 4294967264 }
 0x2e0   :  { %626 = vsyncpa [#allocation5], 1 }
 0x2e1   :  { %627 = vsyncpa [#allocation8], 1 }
 0x2e2   :  { %628 = vsyncpa [#allocation11], 1 }
 0x2e3   :  { %629 = vsyncpa [#allocation14], 1 }
 0x2e4   :  { %630 = vsyncpa [#allocation6], 1 }

</bundles_post_ra>
